<compile_context>
chip_gen: v5e
topology: v5e:2x2
jax: 0.10.0
libtpu: 0.0.40
codegen_flags: <defaults>
</compile_context>

<pallas_src>
import functools

import jax
import jax.numpy as jnp
from jax.experimental import pallas as pl
from jax.experimental.pallas import tpu as pltpu


def _uniface_kernel(bias_ref, cos_ref, out_ref, acc_ref, *, s, l, bc, c_tail):
    """Per-row sum of n_loss over the class axis (C innermost grid axis)."""
    j = pl.program_id(1)
    last = pl.num_programs(1) - 1

    @pl.when(j == 0)
    def _():
        acc_ref[...] = jnp.zeros_like(acc_ref)

    x = cos_ref[...].astype(jnp.float32)          # upcast in-register (bf16 ok)
    z = jnp.clip(s * x - bias_ref[0, 0], -s, s)
    nl = jnp.log(1.0 + jnp.exp(z))                # softplus, torch formula
    if l != 1.0:                                  # static: skip multiply if l==1
        nl = nl * l

    def accumulate(vals):
        # Lane-dense reduction: fold bc columns into 128 lanes with pure VALU
        # adds on 128-aligned slices (no XLU reduce, no narrow store per step).
        acc = acc_ref[...]
        full = bc // 128
        for g in range(full):
            acc = acc + vals[:, g * 128:(g + 1) * 128]
        rem = bc - full * 128
        if rem:                                   # only when block_c == C < mult of 128
            acc = acc + jnp.pad(vals[:, full * 128:], ((0, 0), (0, 128 - rem)))
        acc_ref[...] = acc

    if c_tail == 0:
        accumulate(nl)
    else:
        # Only the last C tile contains out-of-range (padded) columns.
        @pl.when(j != last)
        def _():
            accumulate(nl)

        @pl.when(j == last)
        def _():
            col = jax.lax.broadcasted_iota(jnp.int32, nl.shape, 1)
            accumulate(jnp.where(col < c_tail, nl, 0.0))

    @pl.when(j == last)
    def _():
        out_ref[...] = jnp.sum(acc_ref[...], axis=1, keepdims=True)


def uniface_loss(cos_theta, labels, bias, *, margin=0.4, s=64.0, l=1.0,
                 block_n=None, block_c=None):
    """Fused UniFace loss.  Returns (scalar_loss, 'uniface'), matching torch."""
    N, C = cos_theta.shape

    # ---- tile selection ------------------------------------------------------
    if block_n is None:
        if N <= 8:
            block_n = N
        else:
            # >= 2 steps on the parallel N axis so both v7x TensorCores get work.
            block_n = max(8, min(256, ((N // 2) // 8) * 8))
    if block_c is None:
        if C % 128 != 0:
            block_c = C                                        # full-dim block
        else:
            itemsize = jnp.dtype(cos_theta.dtype).itemsize
            # ~8 MiB per tile -> ~16 MiB double-buffered: safe on v5e/v6e/v7x.
            budget_cols = (8 * 1024 * 1024) // max(1, block_n * itemsize)
            block_c = int(min(C, max(128, (budget_cols // 128) * 128)))
    c_tail = C % block_c

    bias2d = jnp.asarray(bias, jnp.float32).reshape(1, 1)

    kernel = functools.partial(_uniface_kernel, s=float(s), l=float(l),
                               bc=block_c, c_tail=c_tail)

    itemsize = jnp.dtype(cos_theta.dtype).itemsize
    cost = pl.CostEstimate(
        flops=8 * N * C,
        transcendentals=2 * N * C,
        bytes_accessed=N * C * itemsize + N * 4 + 4,
    )

    row_nloss = pl.pallas_call(
        kernel,
        out_shape=jax.ShapeDtypeStruct((N, 1), jnp.float32),
        grid=(pl.cdiv(N, block_n), pl.cdiv(C, block_c)),
        in_specs=[
            pl.BlockSpec(memory_space=pltpu.MemorySpace.SMEM),        # bias (1,1)
            pl.BlockSpec((block_n, block_c), lambda i, j: (i, j)),    # cos tile
        ],
        out_specs=pl.BlockSpec((block_n, 1), lambda i, j: (i, 0)),    # row sums
        scratch_shapes=[pltpu.VMEM((block_n, 128), jnp.float32)],     # lane-dense acc
        compiler_params=pltpu.CompilerParams(
            dimension_semantics=("parallel", "arbitrary"),
            vmem_limit_bytes=32 * 1024 * 1024),
        cost_estimate=cost,
    )(bias2d, cos_theta)                         # NOTE: native dtype, no wrapper cast

    # ---- O(N) target-column correction + valid-row mean (wrapper) ------------
    labels_i = labels.astype(jnp.int32)
    valid = labels_i != -1
    safe = jnp.clip(labels_i, 0, C - 1)
    x_t = jnp.take_along_axis(cos_theta, safe[:, None], axis=1)[:, 0].astype(jnp.float32)
    b = jnp.asarray(bias, jnp.float32).reshape(())
    z_p = jnp.clip(s * (x_t - margin) - b, -s, s)
    z_n = jnp.clip(s * x_t - b, -s, s)
    p_t = jnp.log(1.0 + jnp.exp(-z_p))
    n_t = jnp.log(1.0 + jnp.exp(z_n))
    if l != 1.0:
        n_t = n_t * l
    corr = jnp.where(valid, p_t - n_t, 0.0)       # swap target col n_loss -> p_loss

    row = row_nloss[:, 0] + corr
    vf = valid.astype(jnp.float32)
    # TODO(synk): all-invalid batch returns 0 instead of torch's NaN-from-empty-gather.
    loss = jnp.sum(row * vf) / jnp.maximum(jnp.sum(vf), 1.0)
    return loss, "uniface"


def _reference(cos_theta, labels, bias, *, margin=0.4, s=64.0, l=1.0):
    """Pure-JAX reference of the torch forward (masked instead of gathered)."""
    N, C = cos_theta.shape
    x = cos_theta.astype(jnp.float32)
    valid = labels != -1
    z_p = s * (x - margin) - bias
    z_n = s * x - bias
    p_loss = jnp.log(1.0 + jnp.exp(-jnp.clip(z_p, -s, s)))
    n_loss = jnp.log(1.0 + jnp.exp(jnp.clip(z_n, -s, s))) * l
    one_hot = (jnp.arange(C)[None, :] == labels[:, None]) & valid[:, None]
    row_sums = jnp.where(one_hot, p_loss, n_loss).sum(axis=1)
    vf = valid.astype(jnp.float32)
    return jnp.sum(row_sums * vf) / jnp.maximum(jnp.sum(vf), 1.0)


if __name__ == "__main__":
    key = jax.random.PRNGKey(0)
    k1, k2 = jax.random.split(key)

    # Small shapes consistent with the module: 16 samples, 512 classes.
    N, C = 16, 512
    cos_theta = jax.random.uniform(k1, (N, C), jnp.float32, minval=-1.0, maxval=1.0)
    labels = jax.random.randint(k2, (N,), 0, C, dtype=jnp.int32)
    labels = labels.at[3].set(-1)           # one row with no valid label
    bias = jnp.float32(15.0)                # nn.init.constant_(bias, bias_init=15)

    # f32 input path
    loss, tag = uniface_loss(cos_theta, labels, bias, margin=0.4, s=64.0, l=1.0)
    loss = jax.block_until_ready(loss)
    ref = _reference(cos_theta, labels, bias, margin=0.4, s=64.0, l=1.0)
    assert tag == "uniface"
    assert jnp.allclose(loss, ref, rtol=1e-4, atol=1e-2), (float(loss), float(ref))

    # bf16 input path (native-dtype streaming: no wrapper upcast, half the HBM reads)
    cos_bf16 = cos_theta.astype(jnp.bfloat16)
    loss_bf, _ = uniface_loss(cos_bf16, labels, bias, margin=0.4, s=64.0, l=1.0)
    loss_bf = jax.block_until_ready(loss_bf)
    ref_bf = _reference(cos_bf16.astype(jnp.float32), labels, bias,
                        margin=0.4, s=64.0, l=1.0)
    assert jnp.allclose(loss_bf, ref_bf, rtol=1e-3, atol=1e-1), (
        float(loss_bf), float(ref_bf))

    print("KERNEL_OK")
</pallas_src>

<mosaic_0001>
module attributes {stable_mosaic.version = 11 : i64} {
  func.func @_uniface_kernel(%arg0: i32, %arg1: i32, %arg2: memref<1x1xf32, #tpu.memory_space<smem>>, %arg3: memref<8x512xf32, #tpu.memory_space<vmem>>, %arg4: memref<8x1xf32, #tpu.memory_space<vmem>>, %arg5: memref<8x128xf32, #tpu.memory_space<vmem>>) attributes {dimension_semantics = [#tpu.dimension_semantics<parallel>, #tpu.dimension_semantics<arbitrary>], iteration_bounds = array<i64: 2, 1>, scalar_prefetch = 0 : i64, scratch_operands = 1 : i64, tpu.core_type = #tpu.core_type<tc>, window_params = [{transform_indices = @transform_0, window_bounds = array<i64: 1, 1>}, {transform_indices = @transform_1, window_bounds = array<i64: 8, 512>}, {transform_indices = @transform_2, window_bounds = array<i64: 8, 1>}]} {
    %c0_i32 = arith.constant 0 : i32
    %0 = arith.cmpi eq, %arg1, %c0_i32 : i32
    %1 = arith.extui %0 : i1 to i32
    %c0_i32_0 = arith.constant 0 : i32
    %2 = arith.cmpi ne, %1, %c0_i32_0 : i32
    scf.if %2 {
      %cst_13 = arith.constant 0.000000e+00 : f32
      %30 = vector.broadcast %cst_13 : f32 to vector<8x128xf32>
      %c0_14 = arith.constant 0 : index
      %c0_15 = arith.constant 0 : index
      %31 = vector.load %arg5[%c0_14, %c0_15] : memref<8x128xf32, #tpu.memory_space<vmem>>, vector<8x128xf32>
      tpu.vector_store %arg5[%c0_14, %c0_15], %30 {strides = array<i32>} : memref<8x128xf32, #tpu.memory_space<vmem>>, vector<8x128xf32>,
    } else {
    }
    %c0 = arith.constant 0 : index
    %c0_1 = arith.constant 0 : index
    %3 = vector.load %arg3[%c0, %c0_1] : memref<8x512xf32, #tpu.memory_space<vmem>>, vector<8x512xf32>
    %cst = arith.constant 6.400000e+01 : f32
    %4 = vector.broadcast %cst : f32 to vector<8x512xf32>
    %5 = arith.mulf %4, %3 : vector<8x512xf32>
    %c0_2 = arith.constant 0 : index
    %c0_3 = arith.constant 0 : index
    %6 = memref.load %arg2[%c0_2, %c0_3] : memref<1x1xf32, #tpu.memory_space<smem>>
    %7 = vector.broadcast %6 : f32 to vector<8x512xf32>
    %8 = arith.subf %5, %7 : vector<8x512xf32>
    %cst_4 = arith.constant -6.400000e+01 : f32
    %cst_5 = arith.constant 6.400000e+01 : f32
    %9 = vector.broadcast %cst_4 : f32 to vector<8x512xf32>
    %10 = arith.maximumf %9, %8 : vector<8x512xf32>
    %11 = vector.broadcast %cst_5 : f32 to vector<8x512xf32>
    %12 = arith.minimumf %11, %10 : vector<8x512xf32>
    %13 = math.exp %12 : vector<8x512xf32>
    %cst_6 = arith.constant 1.000000e+00 : f32
    %14 = vector.broadcast %cst_6 : f32 to vector<8x512xf32>
    %15 = arith.addf %14, %13 : vector<8x512xf32>
    %16 = math.log %15 : vector<8x512xf32>
    %c0_7 = arith.constant 0 : index
    %c0_8 = arith.constant 0 : index
    %17 = vector.load %arg5[%c0_7, %c0_8] : memref<8x128xf32, #tpu.memory_space<vmem>>, vector<8x128xf32>
    %18 = vector.extract_strided_slice %16 {offsets = [0, 0], sizes = [8, 128], strides = [1, 1]} : vector<8x512xf32> to vector<8x128xf32>
    %19 = arith.addf %17, %18 : vector<8x128xf32>
    %20 = vector.extract_strided_slice %16 {offsets = [0, 128], sizes = [8, 128], strides = [1, 1]} : vector<8x512xf32> to vector<8x128xf32>
    %21 = arith.addf %19, %20 : vector<8x128xf32>
    %22 = vector.extract_strided_slice %16 {offsets = [0, 256], sizes = [8, 128], strides = [1, 1]} : vector<8x512xf32> to vector<8x128xf32>
    %23 = arith.addf %21, %22 : vector<8x128xf32>
    %24 = vector.extract_strided_slice %16 {offsets = [0, 384], sizes = [8, 128], strides = [1, 1]} : vector<8x512xf32> to vector<8x128xf32>
    %25 = arith.addf %23, %24 : vector<8x128xf32>
    %c0_9 = arith.constant 0 : index
    %c0_10 = arith.constant 0 : index
    %26 = vector.load %arg5[%c0_9, %c0_10] : memref<8x128xf32, #tpu.memory_space<vmem>>, vector<8x128xf32>
    tpu.vector_store %arg5[%c0_9, %c0_10], %25 {strides = array<i32>} : memref<8x128xf32, #tpu.memory_space<vmem>>, vector<8x128xf32>,
    %c0_i32_11 = arith.constant 0 : i32
    %27 = arith.cmpi eq, %arg1, %c0_i32_11 : i32
    %28 = arith.extui %27 : i1 to i32
    %c0_i32_12 = arith.constant 0 : i32
    %29 = arith.cmpi ne, %28, %c0_i32_12 : i32
    scf.if %29 {
      %c0_13 = arith.constant 0 : index
      %c0_14 = arith.constant 0 : index
      %30 = vector.load %arg5[%c0_13, %c0_14] : memref<8x128xf32, #tpu.memory_space<vmem>>, vector<8x128xf32>
      %cst_15 = arith.constant dense<0.000000e+00> : vector<8xf32>
      %31 = vector.multi_reduction <add>, %30, %cst_15 [1] : vector<8x128xf32> to vector<8xf32>
      %32 = vector.shape_cast %31 : vector<8xf32> to vector<8x1xf32>
      %c0_16 = arith.constant 0 : index
      %c0_17 = arith.constant 0 : index
      %33 = vector.load %arg4[%c0_16, %c0_17] : memref<8x1xf32, #tpu.memory_space<vmem>>, vector<8x1xf32>
      tpu.vector_store %arg4[%c0_16, %c0_17], %32 {strides = array<i32>} : memref<8x1xf32, #tpu.memory_space<vmem>>, vector<8x1xf32>,
    } else {
    }
    return
  }
  func.func @transform_0(%arg0: i32, %arg1: i32) -> (i32, i32) {
    %c0_i32 = arith.constant 0 : i32
    %c0_i32_0 = arith.constant 0 : i32
    %c0_i32_1 = arith.constant 0 : i32
    return %c0_i32, %c0_i32_0 : i32, i32
  }
  func.func @transform_1(%arg0: i32, %arg1: i32) -> (i32, i32) {
    %c0_i32 = arith.constant 0 : i32
    return %arg0, %arg1 : i32, i32
  }
  func.func @transform_2(%arg0: i32, %arg1: i32) -> (i32, i32) {
    %c0_i32 = arith.constant 0 : i32
    %c0_i32_0 = arith.constant 0 : i32
    return %arg0, %c0_i32 : i32, i32
  }
}

</mosaic_0001>

<bundles_post_ra>
// kernel: tpu_custom_call.1
= control target key start
LH: loop header
LB: loop body
LE: loop exit
PB: predicated region body
PF: predicated region fallthrough
CT: control target
= control target key end

     0   :  { %s593_s0 = inlined_call_operand.<no memory space> [shape: f32[1,1], index: 0, kind: input, shape index: {}]   ;;  %s594_s1 = inlined_call_operand.hbm [shape: f32[16,512], index: 1, kind: input, shape index: {}]   ;;  %s595_s2 = inlined_call_operand.vmem [shape: f32[16,1], index: 2, kind: output, shape index: {}]  }
   0x1   :  { %7 = sst [smem:[#allocation3]] %s593_s0 }
   0x2   :  { %8 = vsyncpa [#allocation5], 0 }
   0x3   :  { %10 = vsyncpa [#allocation5 + $0x1], 0  ;;  %s505_s11 = smov 0   ;;  %s507_s12 = smov 0  }
   0x4   :  { %s509_s13 = smov 0   ;;  %s511_s14 = smov 0  }
   0x5   :  { %s513_s15 = smov 0   ;;  %s515_s16 = smov 0  }
   0x6 LB: > { %s317_s0 = sadd.s32 4294967295, %s485_s16   ;;  %s28_s17 = sadd.s32 1, %s481_s15  ;;  %s485_s16 = sphi %s515_s16, %s16_s16   ;;  %s481_s15 = sphi %s513_s15, %s602_s15   ;;  %s477_s14 = sphi %s511_s14, %s601_s14   ;;  %s473_s13 = sphi %s509_s13, %s600_s13   ;;  %s469_s12 = sphi %s507_s12, %s599_s12   ;;  %s465_s11 = sphi %s505_s11, %s598_s11  }
   0x7   : > { %p30_p0 = scmp.ge.s32.totalorder %s28_s17, 2  ;;  %s58_s18 = sadd.s32 1, %s473_s13 }
   0x8   : > { %p65_p1 = scmp.ne.s32.totalorder %s473_s13, %s469_s12  ;;  %p66_p2 = scmp.eq.s32.totalorder %s485_s16, 0 }
   0x9   : > { %s604_s17 = smov (%p30_p0, %s28_s17), 0  ;;  %p71_p4 = scmp.ne.s32.totalorder %s469_s12, %s465_s11 }
   0xa   : > { %p541_p3 = por %p66_p2, %p65_p1  ;;  %s53_s20 = ssub.s32 %s481_s15, %s604_s17 }
   0xb   : > { %p72_p5 = scmp.eq.s32.totalorder %s317_s0, 0  ;;  %p56_p6 = scmp.eq.s32.totalorder %s53_s20, 0 }
   0xc   : > { %p340_p8 = scmp.lt.s32.totalorder %s485_s16, 2  ;;  %s124_s23 = sand.u32 1, %s473_s13  }
   0xd   : > { %p548_p7 = por %p72_p5, %p71_p4  ;;  %s333_s24 = sshll.u32 %s481_s15, 5 }
   0xe   : > { %s554_s22 = scalar_select %p56_p6, %s473_s13, %s58_s18  }
   0xf   : > { %s321_s25 = sshll.u32 %s124_s23, 5  ;;  %s135_s28 = scalar_lea.hbm %s594_s1, %s333_s24 }
  0x10   : > { %s137_s29 = sshll.u32 %s135_s28, 4  ;;  %s128_s30 = scalar_lea.vmem [#allocation4], %s321_s25  ;;  %s138_s29 = int_to_ptr.hbm [resolvable:$true] %s137_s29 }
  0x11   : > { %s139_s3 = sshll.u32 %s128_s30, 4  ;;  %p337_p9 = pnand %p340_p8, %p541_p3  ;;  %s140_s3 = int_to_ptr.vmem [resolvable:$true] %s139_s3 }
  0x12   : > { %p324_p10 = scmp.ge.s32.totalorder %s485_s16, 1  ;;  %p144_p11 = scmp.lt.s32.totalorder %s485_s16, 3 }
  0x13   : > { %s125_s4 = scalar_lea.sflag [#allocation5], %s124_s23 }
  0x14   : > { %339 = dma.hbm_to_vmem [thread:$0]  (!%p337_p9), %s138_s29, 512, %s140_s3, %s125_s4  }
  0x15   : > { %p145_p12 = pnand %p324_p10, %p144_p11 }
  0x16   : > { %s150_s5 = sand.u32 (!%p145_p12), 1, %s469_s12  }
  0x17   : > { %148 = sbr.rel (%p145_p12) target bundleno = 184 (0xb8), region = 28  ;;  %s325_s6 = sshll.u32 (!%p145_p12), %s150_s5, 5 }
  0x18   : > { %s151_s7 = scalar_lea.sflag (!%p145_p12), [#allocation5], %s150_s5  ;;  %s154_s8 = scalar_lea.vmem (!%p145_p12), [#allocation4], %s325_s6 }
  0x1c   : > { %460 = dma.done.wait (%p548_p7), %s151_s7, 512  }
  0x1d   : > { %462 = vsyncadd (%p548_p7), %s151_s7, 4294966784  ;;  %s193_s9 = sld [smem:[#allocation3]]  ;;  %v185_v1 = vld [vmem:[%s154_s8] sm:$0xff]  ;;  %v186_v2 = vld [vmem:[%s154_s8 + $0x8] sm:$0xff]  ;;  %p176_p13 = scmp.lt.s32.totalorder %s477_s14, 1  ;;  %vm239_vm0 = vcmask 7168  }
  0x1e   : > { %v187_v3 = vld [vmem:[%s154_s8 + $0x10] sm:$0xff]  ;;  %v188_v4 = vld [vmem:[%s154_s8 + $0x18] sm:$0xff]  ;;  %v189_v5 = vmul.f32 64.0, %v185_v1  ;;  %v190_v6 = vmul.f32 64.0, %v186_v2 }
  0x1f   : > { %v191_v7 = vmul.f32 64.0, %v187_v3  ;;  %v192_v8 = vmul.f32 64.0, %v188_v4  ;;  %s606_s14 = smov (!%p176_p13, %s477_s14), 1 }
  0x20   : > { %s326_s10 = sshll.u32 %s606_s14, 3 }
  0x21   : > { %s179_s18 = scalar_lea.vmem %s595_s2, %s326_s10 }
  0x23   : > { %v194_v0 = vstv %s193_s9 }
  0x24   : > { %v195_v9 = vsub.f32 %v189_v5, %v194_v0  ;;  %v196_v10 = vsub.f32 %v190_v6, %v194_v0  ;;  %v197_v11 = vsub.f32 %v191_v7, %v194_v0  ;;  %v198_v12 = vsub.f32 %v192_v8, %v194_v0 }
  0x26   : > { %v327_v13 = vclamps-f32 %v195_v9, 64.0  ;;  %v328_v14 = vclamps-f32 %v196_v10, 64.0  ;;  %v329_v15 = vclamps-f32 %v197_v11, 64.0  ;;  %v330_v16 = vclamps-f32 %v198_v12, 64.0 }
  0x28   : > { %v207_v17 = vmul.f32 1.442695, %v327_v13  ;;  %v209_v18 = vmul.f32 1.442695, %v328_v14  ;;  %v211_v19 = vmul.f32 1.442695, %v329_v15 }
  0x29   : > { %v213_v20 = vmul.f32 1.442695, %v330_v16 }
  0x2a   : > { %389 = vpow2.f32 %v207_v17 }
  0x2b   : > { %391 = vpow2.f32 %v209_v18 }
  0x2c   : > { %393 = vpow2.f32 %v211_v19 }
  0x2d   : > { %395 = vpow2.f32 %v213_v20 }
  0x30   : > { %v390_v21 = vpop.eup %389 }
  0x31   : > { %v392_v22 = vpop.eup %391  ;;  %v215_v23 = vadd.f32 1.0, %v390_v21 }
  0x32   : > { %v394_v24 = vpop.eup %393  ;;  %v216_v25 = vadd.f32 1.0, %v392_v22 }
  0x33   : > { %v396_v26 = vpop.eup %395  ;;  %v217_v27 = vadd.f32 1.0, %v394_v24  ;;  %397 = vlog2.f32 %v215_v23 }
  0x34   : > { %v218_v28 = vadd.f32 1.0, %v396_v26  ;;  %399 = vlog2.f32 %v216_v25 }
  0x35   : > { %401 = vlog2.f32 %v217_v27 }
  0x36   : > { %403 = vlog2.f32 %v218_v28 }
  0x39   : > { %v398_v29 = vpop.eup %397 }
  0x3a   : > { %v400_v30 = vpop.eup %399  ;;  %v220_v31 = vmul.f32 0.6931472, %v398_v29 }
  0x3b   : > { %v402_v32 = vpop.eup %401  ;;  %v222_v33 = vmul.f32 0.6931472, %v400_v30 }
  0x3c   : > { %v404_v34 = vpop.eup %403  ;;  %v224_v35 = vmul.f32 0.6931472, %v402_v32 }
  0x3d   : > { %v226_v36 = vmul.f32 0.6931472, %v404_v34  ;;  %v229_v37 = vadd.f32 %v222_v33, %v220_v31 }
  0x3f   : > { %v230_v38 = vadd.f32 %v229_v37, %v224_v35 }
  0x41   : > { %v231_v39 = vadd.f32 %v230_v38, %v226_v36 }
  0x43   : > { %237 = vadd.xlane.f32.xlu0 %v231_v39 }
  0xb6   : > { %v238_v40 = vpop.xlane.xlu0 %237 }
  0xb7   : > { %240 = vst.msk [vmem:[%s179_s18] sm:$0xff] %vm239_vm0, %v238_v40 }
  0xb8 PF: > { %s16_s16 = sadd.s32 1, %s485_s16   ;;  %s598_s11 = smov %s469_s12 }
  0xb9   : > { %p13_p0 = scmp.ge.s32.totalorder %s16_s16, 4   ;;  %s599_s12 = smov %s473_s13 }
  0xba   : > { %s600_s13 = smov %s554_s22  ;;  %s601_s14 = smov %s481_s15 }
  0xbb   : > { %s602_s15 = smov %s604_s17  ;;  %15 = sbr.rel (!%p13_p0) target bundleno = 6 (0x6), region = 76 }
  0xc0   :  { %260 = vsyncpa [#allocation5], 1 }
  0xc1   :  { %262 = vsyncpa [#allocation5 + $0x1], 1 }

</bundles_post_ra>
